<compile_context>
chip_gen: v6e
topology: v6e:2x2x1
jax: 0.10.0
libtpu: 0.0.40
codegen_flags: <defaults>
</compile_context>

<pallas_src>
import functools

import jax
import jax.numpy as jnp
from jax import lax
from jax.experimental import pallas as pl
from jax.experimental.pallas import tpu as pltpu


def _round_up(n, m=8):
    return ((n + m - 1) // m) * m


# --------------------------------------------------------------------------- #
# Kernel
# --------------------------------------------------------------------------- #
def _deepmf_kernel(rows_ref, cols_ref, w_ref, b_ref,
                   yhat_ref, rnorm_ref, cnorm_ref,
                   h_s,
                   *, n_rows, n_cols, in_r, in_c, nr_pad,
                   col_in_off, width, n_layers, encoded_dim):
    f32 = jnp.float32
    # "A @ B.T" form: contract the last dim of both operands (no XLU transpose).
    dn_t = (((1,), (1,)), ((), ()))
    n_total = h_s.shape[0]

    # ---- layer 1: two slice-addressed dots straight from the raw inputs ------
    # The layer-1 weight block is block-diagonal inside the slab, so each input
    # only needs its own row range of the slab; the other output block is 0.
    h_s[...] = jnp.zeros_like(h_s)                       # padded batch rows -> 0
    hr = jnp.dot(rows_ref[...], w_ref[0:in_r, :], preferred_element_type=f32)
    hr = jnp.maximum(hr + b_ref[0:1, :], 0.0)            # (n_rows, W)
    hc = jnp.dot(cols_ref[...], w_ref[col_in_off:col_in_off + in_c, :],
                 preferred_element_type=f32)
    hc = jnp.maximum(hc + b_ref[1:2, :], 0.0)            # (n_cols, W)
    h_s[pl.ds(0, n_rows), :] = hr                        # row batch block
    h_s[pl.ds(nr_pad, n_cols), :] = hc                   # col batch block

    # ---- layers 2..L: fused block-diagonal matmuls on the packed batch -------
    is_row = lax.broadcasted_iota(jnp.int32, (n_total, 1), 0) < nr_pad
    h = h_s[...]
    for l in range(1, n_layers):
        w = w_ref[l * width:(l + 1) * width, :]          # static (W, W) view
        b = jnp.where(is_row, b_ref[2 * l:2 * l + 1, :],
                      b_ref[2 * l + 1:2 * l + 2, :])     # per-batch-block bias row
        h = jnp.maximum(jnp.dot(h, w, preferred_element_type=f32) + b, 0.0)

    e = h                                # (n_total, W); lanes >= encoded_dim are 0
    r = e[0:nr_pad, :]                   # row embeddings (unclamped)
    c = e[nr_pad:, :]                    # col embeddings (unclamped)

    # ---- Y_hat from unclamped embeddings (matches torch ordering) ------------
    y = lax.dot_general(r, c, dn_t, preferred_element_type=f32)  # (nr_pad, nc_pad)

    # ---- clamp, keep lane padding exactly zero, square ----------------------
    lane = lax.broadcasted_iota(jnp.int32, e.shape, 1)
    e_cl = jnp.where(lane < encoded_dim, jnp.maximum(e, 1e-07), 0.0)
    esq = e_cl * e_cl
    r_sq = esq[0:nr_pad, :]
    c_sq = esq[nr_pad:, :]

    # ---- lane-dense sum-of-squares via a (1, W) ones-contraction on the MXU --
    # Clamp above guarantees every sum-of-squares >= encoded_dim * 1e-14, so the
    # rsqrt below never sees 0 even for padded batch rows.
    ones_e = jnp.ones((1, width), f32)
    ssr = lax.dot_general(ones_e, r_sq, dn_t, preferred_element_type=f32)  # (1, nr_pad)
    ssc = lax.dot_general(ones_e, c_sq, dn_t, preferred_element_type=f32)  # (1, nc_pad)

    rnorm_ref[...] = jnp.sqrt(ssr)       # (1, nr_pad) lane-major
    cnorm_ref[...] = jnp.sqrt(ssc)       # (1, nc_pad) lane-dense

    # ---- normalization: EUP rsqrt + multiplies instead of full-matrix divide -
    inv_r = lax.rsqrt(jnp.sum(r_sq, axis=1, keepdims=True))   # (nr_pad, 1)
    inv_c = lax.rsqrt(ssc)                                    # (1, nc_pad)
    y = y * inv_r * inv_c
    yhat_ref[...] = jnp.clip(y, 1e-05, 0.99999)               # lane-dense store


# --------------------------------------------------------------------------- #
# Parameter construction / packing (wrapper side, done once outside the jit)
# --------------------------------------------------------------------------- #
def init_params(key, input_size, hidden_size_row, hidden_size_col, encoded_dim=10):
    """PyTorch-Linear-style init; weights stored as (in_features, out_features)."""
    dims_row = [input_size[1], hidden_size_row * 2, hidden_size_row,
                hidden_size_row // 2, encoded_dim]
    dims_col = [input_size[0], hidden_size_col * 2, hidden_size_col,
                hidden_size_col // 2, encoded_dim]
    towers = []
    for dims in (dims_row, dims_col):
        layers = []
        for fin, fout in zip(dims[:-1], dims[1:]):
            key, kw, kb = jax.random.split(key, 3)
            bound = 1.0 / (fin ** 0.5)
            w = jax.random.uniform(kw, (fin, fout), jnp.float32, -bound, bound)
            b = jax.random.uniform(kb, (fout,), jnp.float32, -bound, bound)
            layers.append((w, b))
        towers.append(layers)
    return towers[0], towers[1]          # row_layers, col_layers (4 each)


def pack_params(row_layers, col_layers):
    """Fuse the two towers into one uniform-width weight slab + one bias slab.

    Layers 1..L-1 are packed block-diagonally ([[Wr,0],[0,Wc]]); the output layer
    maps both batch blocks onto the same encoded columns.  Every layer block is
    a (W, W) tile of one (L*W, W) slab (W = max packed layer width), and biases
    are two rows (row-block / col-block) per layer in a (2*L, W) slab.  Padding
    is exact: padded weight rows/cols and bias lanes are zero, so padded lanes
    stay exactly zero through ReLU.
    """
    n_layers = len(row_layers)
    in_r = row_layers[0][0].shape[0]
    in_c = col_layers[0][0].shape[0]
    col_in_off = _round_up(in_r, 8)

    width = col_in_off + _round_up(in_c, 8)              # packed input width
    for l, ((wr, _), (wc, _)) in enumerate(zip(row_layers, col_layers)):
        fout_r, fout_c = wr.shape[1], wc.shape[1]
        if l == n_layers - 1:
            out_w = _round_up(max(fout_r, fout_c), 8)
        else:
            out_w = _round_up(fout_r, 8) + _round_up(fout_c, 8)
        width = max(width, out_w)
    width = _round_up(width, 8)

    w_slab = jnp.zeros((n_layers * width, width), jnp.float32)
    b_slab = jnp.zeros((2 * n_layers, width), jnp.float32)
    for l, ((wr, br), (wc, bc)) in enumerate(zip(row_layers, col_layers)):
        fin_r, fout_r = wr.shape
        fin_c, fout_c = wc.shape
        c_in_off = col_in_off if l == 0 else _round_up(fin_r, 8)
        c_out_off = 0 if l == n_layers - 1 else _round_up(fout_r, 8)
        r0 = l * width
        w_slab = w_slab.at[r0:r0 + fin_r, 0:fout_r].set(wr)
        w_slab = w_slab.at[r0 + c_in_off:r0 + c_in_off + fin_c,
                           c_out_off:c_out_off + fout_c].set(wc)
        b_slab = b_slab.at[2 * l, 0:fout_r].set(br)
        b_slab = b_slab.at[2 * l + 1, c_out_off:c_out_off + fout_c].set(bc)

    meta = dict(col_in_off=col_in_off, n_layers=n_layers, width=width)
    return w_slab, b_slab, meta


# --------------------------------------------------------------------------- #
# Forward wrapper
# --------------------------------------------------------------------------- #
@functools.partial(jax.jit,
                   static_argnames=("col_in_off", "n_layers", "encoded_dim"))
def parallel_layers_forward(rows, cols, w_slab, b_slab, *,
                            col_in_off, n_layers, encoded_dim):
    rows = rows.astype(jnp.float32)
    cols = cols.astype(jnp.float32)
    n_rows, in_r = rows.shape
    n_cols, in_c = cols.shape
    width = w_slab.shape[1]

    nr_pad = _round_up(n_rows, 8)        # sublane-aligned row batch block
    nc_pad = _round_up(n_cols, 128)      # lane-dense Y_hat / col-norm stores
    n_total = nr_pad + nc_pad

    kernel = functools.partial(
        _deepmf_kernel,
        n_rows=n_rows, n_cols=n_cols, in_r=in_r, in_c=in_c, nr_pad=nr_pad,
        col_in_off=col_in_off, width=width, n_layers=n_layers,
        encoded_dim=encoded_dim)
    vmem = pl.BlockSpec(memory_space=pltpu.MemorySpace.VMEM)

    y_hat, rnorm, cnorm = pl.pallas_call(
        kernel,
        out_shape=(
            jax.ShapeDtypeStruct((nr_pad, nc_pad), jnp.float32),
            jax.ShapeDtypeStruct((1, nr_pad), jnp.float32),
            jax.ShapeDtypeStruct((1, nc_pad), jnp.float32),
        ),
        in_specs=[vmem, vmem, vmem, vmem],
        out_specs=(vmem, vmem, vmem),
        scratch_shapes=[pltpu.VMEM((n_total, width), jnp.float32)],
    )(rows, cols, w_slab, b_slab)

    return y_hat[:n_rows, :n_cols], rnorm[0, :n_rows], cnorm[0, :n_cols]


# --------------------------------------------------------------------------- #
# Pure-JAX reference (mirrors the PyTorch forward) for a sanity check
# --------------------------------------------------------------------------- #
def reference_forward(rows, cols, row_layers, col_layers):
    def tower(x, layers):
        for w, b in layers:
            x = jnp.maximum(x @ w + b, 0.0)
        return x
    r = tower(rows, row_layers)
    c = tower(cols, col_layers)
    y = r @ c.T
    r_cl = jnp.maximum(r, 1e-07)
    c_cl = jnp.maximum(c, 1e-07)
    rn = jnp.sqrt(jnp.sum(r_cl * r_cl, axis=1))
    cn = jnp.sqrt(jnp.sum(c_cl * c_cl, axis=1))
    y = y / (rn[:, None] * cn[None, :])
    return jnp.clip(y, 1e-05, 0.99999), rn, cn


if __name__ == "__main__":
    # Rating matrix Y is (n_rows, n_cols) = input_size
    input_size = (16, 32)
    hidden_size_row = 16
    hidden_size_col = 16
    encoded_dim = 10

    key = jax.random.PRNGKey(0)
    key, k_rows, k_cols = jax.random.split(key, 3)
    rows = jax.random.uniform(k_rows, (input_size[0], input_size[1]), jnp.float32)
    cols = jax.random.uniform(k_cols, (input_size[1], input_size[0]), jnp.float32)

    row_layers, col_layers = init_params(
        key, input_size, hidden_size_row, hidden_size_col, encoded_dim)
    w_slab, b_slab, meta = pack_params(row_layers, col_layers)

    y_hat, row_norms, col_norms = parallel_layers_forward(
        rows, cols, w_slab, b_slab,
        col_in_off=meta["col_in_off"], n_layers=meta["n_layers"],
        encoded_dim=encoded_dim)
    jax.block_until_ready((y_hat, row_norms, col_norms))

    assert y_hat.shape == (input_size[0], input_size[1])
    assert row_norms.shape == (input_size[0],)
    assert col_norms.shape == (input_size[1],)
    assert bool(jnp.all(jnp.isfinite(y_hat)))
    assert bool(jnp.all(y_hat >= 1e-05)) and bool(jnp.all(y_hat <= 0.99999))

    # Loose tolerances: matmul precision modes differ between Mosaic and XLA.
    y_ref, rn_ref, cn_ref = reference_forward(rows, cols, row_layers, col_layers)
    assert bool(jnp.allclose(y_hat, y_ref, rtol=5e-2, atol=5e-3))
    assert bool(jnp.allclose(row_norms, rn_ref, rtol=5e-2, atol=5e-3))
    assert bool(jnp.allclose(col_norms, cn_ref, rtol=5e-2, atol=5e-3))

    print("KERNEL_OK")
</pallas_src>

<mosaic_0001>
module attributes {stable_mosaic.version = 11 : i64} {
  func.func @_deepmf_kernel(%arg0: memref<16x32xf32, #tpu.memory_space<vmem>>, %arg1: memref<32x16xf32, #tpu.memory_space<vmem>>, %arg2: memref<256x64xf32, #tpu.memory_space<vmem>>, %arg3: memref<8x64xf32, #tpu.memory_space<vmem>>, %arg4: memref<16x128xf32, #tpu.memory_space<vmem>>, %arg5: memref<1x16xf32, #tpu.memory_space<vmem>>, %arg6: memref<1x128xf32, #tpu.memory_space<vmem>>, %arg7: memref<144x64xf32, #tpu.memory_space<vmem>>) attributes {dimension_semantics = [], scalar_prefetch = 0 : i64, scratch_operands = 1 : i64, tpu.core_type = #tpu.core_type<tc>} {
    %cst = arith.constant 0.000000e+00 : f32
    %0 = vector.broadcast %cst : f32 to vector<144x64xf32>
    %c0 = arith.constant 0 : index
    %c0_0 = arith.constant 0 : index
    %1 = vector.load %arg7[%c0, %c0_0] : memref<144x64xf32, #tpu.memory_space<vmem>>, vector<144x64xf32>
    tpu.vector_store %arg7[%c0, %c0_0], %0 {strides = array<i32>} : memref<144x64xf32, #tpu.memory_space<vmem>>, vector<144x64xf32>,
    %c0_1 = arith.constant 0 : index
    %c0_2 = arith.constant 0 : index
    %2 = vector.load %arg0[%c0_1, %c0_2] : memref<16x32xf32, #tpu.memory_space<vmem>>, vector<16x32xf32>
    %c0_3 = arith.constant 0 : index
    %c0_4 = arith.constant 0 : index
    %3 = vector.load %arg2[%c0_3, %c0_4] : memref<256x64xf32, #tpu.memory_space<vmem>>, vector<32x64xf32>
    %cst_5 = arith.constant dense<0.000000e+00> : vector<16x64xf32>
    %4 = tpu.matmul %2, %3, %cst_5 {dimension_numbers = #tpu.dot_dimension_numbers<[1], [0], [0], [1], [0, 0, 1, 1], [], []>} : vector<16x32xf32>, vector<32x64xf32>, vector<16x64xf32> -> vector<16x64xf32>
    %c0_6 = arith.constant 0 : index
    %c0_7 = arith.constant 0 : index
    %5 = vector.load %arg3[%c0_6, %c0_7] : memref<8x64xf32, #tpu.memory_space<vmem>>, vector<1x64xf32>
    %6 = vector.broadcast %5 : vector<1x64xf32> to vector<16x64xf32>
    %7 = arith.addf %4, %6 : vector<16x64xf32>
    %cst_8 = arith.constant 0.000000e+00 : f32
    %8 = vector.broadcast %cst_8 : f32 to vector<16x64xf32>
    %9 = arith.maximumf %7, %8 : vector<16x64xf32>
    %c0_9 = arith.constant 0 : index
    %c0_10 = arith.constant 0 : index
    %10 = vector.load %arg1[%c0_9, %c0_10] : memref<32x16xf32, #tpu.memory_space<vmem>>, vector<32x16xf32>
    %c32 = arith.constant 32 : index
    %c0_11 = arith.constant 0 : index
    %11 = vector.load %arg2[%c32, %c0_11] : memref<256x64xf32, #tpu.memory_space<vmem>>, vector<16x64xf32>
    %cst_12 = arith.constant dense<0.000000e+00> : vector<32x64xf32>
    %12 = tpu.matmul %10, %11, %cst_12 {dimension_numbers = #tpu.dot_dimension_numbers<[1], [0], [0], [1], [0, 0, 1, 1], [], []>} : vector<32x16xf32>, vector<16x64xf32>, vector<32x64xf32> -> vector<32x64xf32>
    %c1 = arith.constant 1 : index
    %c0_13 = arith.constant 0 : index
    %13 = vector.load %arg3[%c1, %c0_13] : memref<8x64xf32, #tpu.memory_space<vmem>>, vector<1x64xf32>
    %14 = vector.broadcast %13 : vector<1x64xf32> to vector<32x64xf32>
    %15 = arith.addf %12, %14 : vector<32x64xf32>
    %cst_14 = arith.constant 0.000000e+00 : f32
    %16 = vector.broadcast %cst_14 : f32 to vector<32x64xf32>
    %17 = arith.maximumf %15, %16 : vector<32x64xf32>
    %c0_15 = arith.constant 0 : index
    %c0_16 = arith.constant 0 : index
    %18 = vector.load %arg7[%c0_15, %c0_16] : memref<144x64xf32, #tpu.memory_space<vmem>>, vector<16x64xf32>
    tpu.vector_store %arg7[%c0_15, %c0_16], %9 {strides = array<i32>} : memref<144x64xf32, #tpu.memory_space<vmem>>, vector<16x64xf32>,
    %c16 = arith.constant 16 : index
    %c0_17 = arith.constant 0 : index
    %19 = vector.load %arg7[%c16, %c0_17] : memref<144x64xf32, #tpu.memory_space<vmem>>, vector<32x64xf32>
    tpu.vector_store %arg7[%c16, %c0_17], %17 {strides = array<i32>} : memref<144x64xf32, #tpu.memory_space<vmem>>, vector<32x64xf32>,
    %20 = tpu.iota {dimensions = array<i32: 0>} : vector<144x1xi32>
    %c16_i32 = arith.constant 16 : i32
    %21 = vector.broadcast %c16_i32 : i32 to vector<144x1xi32>
    %22 = arith.cmpi slt, %20, %21 : vector<144x1xi32>
    %c0_18 = arith.constant 0 : index
    %c0_19 = arith.constant 0 : index
    %23 = vector.load %arg7[%c0_18, %c0_19] : memref<144x64xf32, #tpu.memory_space<vmem>>, vector<144x64xf32>
    %c64 = arith.constant 64 : index
    %c0_20 = arith.constant 0 : index
    %24 = vector.load %arg2[%c64, %c0_20] : memref<256x64xf32, #tpu.memory_space<vmem>>, vector<64x64xf32>
    %c2 = arith.constant 2 : index
    %c0_21 = arith.constant 0 : index
    %25 = vector.load %arg3[%c2, %c0_21] : memref<8x64xf32, #tpu.memory_space<vmem>>, vector<1x64xf32>
    %c3 = arith.constant 3 : index
    %c0_22 = arith.constant 0 : index
    %26 = vector.load %arg3[%c3, %c0_22] : memref<8x64xf32, #tpu.memory_space<vmem>>, vector<1x64xf32>
    %27 = vector.shape_cast %22 : vector<144x1xi1> to vector<144x1xi1>
    %28 = vector.broadcast %27 : vector<144x1xi1> to vector<144x64xi1>
    %29 = vector.shape_cast %25 : vector<1x64xf32> to vector<1x64xf32>
    %30 = vector.broadcast %29 : vector<1x64xf32> to vector<144x64xf32>
    %31 = vector.shape_cast %26 : vector<1x64xf32> to vector<1x64xf32>
    %32 = vector.broadcast %31 : vector<1x64xf32> to vector<144x64xf32>
    %33 = arith.select %28, %30, %32 : vector<144x64xi1>, vector<144x64xf32>
    %cst_23 = arith.constant dense<0.000000e+00> : vector<144x64xf32>
    %34 = tpu.matmul %23, %24, %cst_23 {dimension_numbers = #tpu.dot_dimension_numbers<[1], [0], [0], [1], [0, 0, 1, 1], [], []>} : vector<144x64xf32>, vector<64x64xf32>, vector<144x64xf32> -> vector<144x64xf32>
    %35 = arith.addf %34, %33 : vector<144x64xf32>
    %cst_24 = arith.constant 0.000000e+00 : f32
    %36 = vector.broadcast %cst_24 : f32 to vector<144x64xf32>
    %37 = arith.maximumf %35, %36 : vector<144x64xf32>
    %c128 = arith.constant 128 : index
    %c0_25 = arith.constant 0 : index
    %38 = vector.load %arg2[%c128, %c0_25] : memref<256x64xf32, #tpu.memory_space<vmem>>, vector<64x64xf32>
    %c4 = arith.constant 4 : index
    %c0_26 = arith.constant 0 : index
    %39 = vector.load %arg3[%c4, %c0_26] : memref<8x64xf32, #tpu.memory_space<vmem>>, vector<1x64xf32>
    %c5 = arith.constant 5 : index
    %c0_27 = arith.constant 0 : index
    %40 = vector.load %arg3[%c5, %c0_27] : memref<8x64xf32, #tpu.memory_space<vmem>>, vector<1x64xf32>
    %41 = vector.shape_cast %22 : vector<144x1xi1> to vector<144x1xi1>
    %42 = vector.broadcast %41 : vector<144x1xi1> to vector<144x64xi1>
    %43 = vector.shape_cast %39 : vector<1x64xf32> to vector<1x64xf32>
    %44 = vector.broadcast %43 : vector<1x64xf32> to vector<144x64xf32>
    %45 = vector.shape_cast %40 : vector<1x64xf32> to vector<1x64xf32>
    %46 = vector.broadcast %45 : vector<1x64xf32> to vector<144x64xf32>
    %47 = arith.select %42, %44, %46 : vector<144x64xi1>, vector<144x64xf32>
    %cst_28 = arith.constant dense<0.000000e+00> : vector<144x64xf32>
    %48 = tpu.matmul %37, %38, %cst_28 {dimension_numbers = #tpu.dot_dimension_numbers<[1], [0], [0], [1], [0, 0, 1, 1], [], []>} : vector<144x64xf32>, vector<64x64xf32>, vector<144x64xf32> -> vector<144x64xf32>
    %49 = arith.addf %48, %47 : vector<144x64xf32>
    %cst_29 = arith.constant 0.000000e+00 : f32
    %50 = vector.broadcast %cst_29 : f32 to vector<144x64xf32>
    %51 = arith.maximumf %49, %50 : vector<144x64xf32>
    %c192 = arith.constant 192 : index
    %c0_30 = arith.constant 0 : index
    %52 = vector.load %arg2[%c192, %c0_30] : memref<256x64xf32, #tpu.memory_space<vmem>>, vector<64x64xf32>
    %c6 = arith.constant 6 : index
    %c0_31 = arith.constant 0 : index
    %53 = vector.load %arg3[%c6, %c0_31] : memref<8x64xf32, #tpu.memory_space<vmem>>, vector<1x64xf32>
    %c7 = arith.constant 7 : index
    %c0_32 = arith.constant 0 : index
    %54 = vector.load %arg3[%c7, %c0_32] : memref<8x64xf32, #tpu.memory_space<vmem>>, vector<1x64xf32>
    %55 = vector.shape_cast %22 : vector<144x1xi1> to vector<144x1xi1>
    %56 = vector.broadcast %55 : vector<144x1xi1> to vector<144x64xi1>
    %57 = vector.shape_cast %53 : vector<1x64xf32> to vector<1x64xf32>
    %58 = vector.broadcast %57 : vector<1x64xf32> to vector<144x64xf32>
    %59 = vector.shape_cast %54 : vector<1x64xf32> to vector<1x64xf32>
    %60 = vector.broadcast %59 : vector<1x64xf32> to vector<144x64xf32>
    %61 = arith.select %56, %58, %60 : vector<144x64xi1>, vector<144x64xf32>
    %cst_33 = arith.constant dense<0.000000e+00> : vector<144x64xf32>
    %62 = tpu.matmul %51, %52, %cst_33 {dimension_numbers = #tpu.dot_dimension_numbers<[1], [0], [0], [1], [0, 0, 1, 1], [], []>} : vector<144x64xf32>, vector<64x64xf32>, vector<144x64xf32> -> vector<144x64xf32>
    %63 = arith.addf %62, %61 : vector<144x64xf32>
    %cst_34 = arith.constant 0.000000e+00 : f32
    %64 = vector.broadcast %cst_34 : f32 to vector<144x64xf32>
    %65 = arith.maximumf %63, %64 : vector<144x64xf32>
    %66 = vector.extract_strided_slice %65 {offsets = [0, 0], sizes = [16, 64], strides = [1, 1]} : vector<144x64xf32> to vector<16x64xf32>
    %67 = vector.extract_strided_slice %65 {offsets = [16, 0], sizes = [128, 64], strides = [1, 1]} : vector<144x64xf32> to vector<128x64xf32>
    %cst_35 = arith.constant dense<0.000000e+00> : vector<16x128xf32>
    %68 = tpu.matmul %66, %67, %cst_35 {dimension_numbers = #tpu.dot_dimension_numbers<[1], [1], [0], [0], [0, 0, 1, 0], [], []>} : vector<16x64xf32>, vector<128x64xf32>, vector<16x128xf32> -> vector<16x128xf32>
    %69 = tpu.iota {dimensions = array<i32: 1>} : vector<144x64xi32>
    %c10_i32 = arith.constant 10 : i32
    %70 = vector.broadcast %c10_i32 : i32 to vector<144x64xi32>
    %71 = arith.cmpi slt, %69, %70 : vector<144x64xi32>
    %cst_36 = arith.constant 1.000000e-07 : f32
    %72 = vector.broadcast %cst_36 : f32 to vector<144x64xf32>
    %73 = arith.maximumf %65, %72 : vector<144x64xf32>
    %cst_37 = arith.constant 0.000000e+00 : f32
    %74 = vector.broadcast %cst_37 : f32 to vector<144x64xf32>
    %75 = arith.select %71, %73, %74 : vector<144x64xi1>, vector<144x64xf32>
    %76 = arith.mulf %75, %75 : vector<144x64xf32>
    %77 = vector.extract_strided_slice %76 {offsets = [0, 0], sizes = [16, 64], strides = [1, 1]} : vector<144x64xf32> to vector<16x64xf32>
    %78 = vector.extract_strided_slice %76 {offsets = [16, 0], sizes = [128, 64], strides = [1, 1]} : vector<144x64xf32> to vector<128x64xf32>
    %cst_38 = arith.constant 1.000000e+00 : f32
    %79 = vector.broadcast %cst_38 : f32 to vector<1x64xf32>
    %cst_39 = arith.constant dense<0.000000e+00> : vector<1x16xf32>
    %80 = tpu.matmul %79, %77, %cst_39 {dimension_numbers = #tpu.dot_dimension_numbers<[1], [1], [0], [0], [0, 0, 1, 0], [], []>} : vector<1x64xf32>, vector<16x64xf32>, vector<1x16xf32> -> vector<1x16xf32>
    %cst_40 = arith.constant dense<0.000000e+00> : vector<1x128xf32>
    %81 = tpu.matmul %79, %78, %cst_40 {dimension_numbers = #tpu.dot_dimension_numbers<[1], [1], [0], [0], [0, 0, 1, 0], [], []>} : vector<1x64xf32>, vector<128x64xf32>, vector<1x128xf32> -> vector<1x128xf32>
    %82 = math.sqrt %80 : vector<1x16xf32>
    %c0_41 = arith.constant 0 : index
    %c0_42 = arith.constant 0 : index
    %83 = vector.load %arg5[%c0_41, %c0_42] : memref<1x16xf32, #tpu.memory_space<vmem>>, vector<1x16xf32>
    tpu.vector_store %arg5[%c0_41, %c0_42], %82 {strides = array<i32>} : memref<1x16xf32, #tpu.memory_space<vmem>>, vector<1x16xf32>,
    %84 = math.sqrt %81 : vector<1x128xf32>
    %c0_43 = arith.constant 0 : index
    %c0_44 = arith.constant 0 : index
    %85 = vector.load %arg6[%c0_43, %c0_44] : memref<1x128xf32, #tpu.memory_space<vmem>>, vector<1x128xf32>
    tpu.vector_store %arg6[%c0_43, %c0_44], %84 {strides = array<i32>} : memref<1x128xf32, #tpu.memory_space<vmem>>, vector<1x128xf32>,
    %cst_45 = arith.constant dense<0.000000e+00> : vector<16xf32>
    %86 = vector.multi_reduction <add>, %77, %cst_45 [1] : vector<16x64xf32> to vector<16xf32>
    %87 = vector.shape_cast %86 : vector<16xf32> to vector<16x1xf32>
    %88 = math.rsqrt %87 : vector<16x1xf32>
    %89 = math.rsqrt %81 : vector<1x128xf32>
    %90 = vector.broadcast %88 : vector<16x1xf32> to vector<16x128xf32>
    %91 = arith.mulf %68, %90 : vector<16x128xf32>
    %92 = vector.broadcast %89 : vector<1x128xf32> to vector<16x128xf32>
    %93 = arith.mulf %91, %92 : vector<16x128xf32>
    %cst_46 = arith.constant 9.99999974E-6 : f32
    %cst_47 = arith.constant 0.999989986 : f32
    %94 = vector.broadcast %cst_46 : f32 to vector<16x128xf32>
    %95 = arith.maximumf %94, %93 : vector<16x128xf32>
    %96 = vector.broadcast %cst_47 : f32 to vector<16x128xf32>
    %97 = arith.minimumf %96, %95 : vector<16x128xf32>
    %c0_48 = arith.constant 0 : index
    %c0_49 = arith.constant 0 : index
    %98 = vector.load %arg4[%c0_48, %c0_49] : memref<16x128xf32, #tpu.memory_space<vmem>>, vector<16x128xf32>
    tpu.vector_store %arg4[%c0_48, %c0_49], %97 {strides = array<i32>} : memref<16x128xf32, #tpu.memory_space<vmem>>, vector<16x128xf32>,
    return
  }
}

</mosaic_0001>

<bundles_post_ra>
// kernel: parallel_layers_forward.1
= control target key start
LH: loop header
LB: loop body
LE: loop exit
PB: predicated region body
PF: predicated region fallthrough
CT: control target
= control target key end

     0   :  { %12 = vsyncpa [#allocation4], 0  ;;  %vm52_vm0 = vcmask 261120   ;;  %vm22_vm1 = vcmask 523264   ;;  %v2128_v6 = vmov 0.0   ;;  %vm147_vm2 = vcmask 130048   ;;  %s2613_s0 = inlined_call_operand.vmem [shape: f32[16,32], index: 0, kind: input, shape index: {}]   ;;  %s2614_s1 = inlined_call_operand.vmem [shape: f32[32,16], index: 1, kind: input, shape index: {}]   ;;  %s2615_s2 = inlined_call_operand.vmem [shape: f32[256,64], index: 2, kind: input, shape index: {}]   ;;  %s2616_s3 = inlined_call_operand.vmem [shape: f32[8,64], index: 3, kind: input, shape index: {}]   ;;  %s2617_s4 = inlined_call_operand.hbm [shape: f32[16,128], index: 4, kind: output, shape index: {0}]   ;;  %s2618_s5 = inlined_call_operand.hbm [shape: f32[1,16], index: 5, kind: output, shape index: {1}]   ;;  %s2619_s6 = inlined_call_operand.vmem [shape: f32[1,128], index: 6, kind: output, shape index: {2}]  }
   0x1   :  { %v46_v0 = vld [vmem:[%s2615_s2 + $0x18] sm:$0xff]  ;;  %v45_v1 = vld [vmem:[%s2615_s2 + $0x10] sm:$0xff]  ;;  %v141_v2 = vld [vmem:[%s2615_s2 + $0x28] sm:$0xff]  ;;  %24 = vst.msk [vmem:[#allocation2 + $0x8] sm:$0xff] %vm22_vm1, %v2128_v6 }
   0x2   :  { %1826 = vmatprep.subr.mxu0 %v46_v0  ;;  %v41_v3 = vld [vmem:[%s2613_s0] sm:$0xff]  ;;  %v44_v4 = vld [vmem:[%s2615_s2 + $0x8] sm:$0xff]  ;;  %1837 = vmatprep.subr.mxu1 %v141_v2  ;;  %23 = vst.msk [vmem:[#allocation2] sm:$0xff] %vm22_vm1, %v2128_v6  ;;  %25 = vst.msk [vmem:[#allocation2 + $0x10] sm:$0xff] %vm22_vm1, %v2128_v6 }
   0x3   :  { %1827 = vmatpush3.msra.mxu0 %v46_v0  ;;  %v140_v5 = vld [vmem:[%s2615_s2 + $0x20] sm:$0xff]  ;;  %26 = vst.msk [vmem:[#allocation2 + $0x18] sm:$0xff] %vm22_vm1, %v2128_v6  ;;  %27 = vst.msk [vmem:[#allocation2 + $0x20] sm:$0xff] %vm22_vm1, %v2128_v6  ;;  %1834 = vmatprep.mubr.msk.f32.mxu0 %vm52_vm0, %v41_v3 }
   0x4   :  { %28 = vst.msk [vmem:[#allocation2 + $0x28] sm:$0xff] %vm22_vm1, %v2128_v6  ;;  %29 = vst.msk [vmem:[#allocation2 + $0x30] sm:$0xff] %vm22_vm1, %v2128_v6  ;;  %1828 = vmatprep.subr.mxu0 %v45_v1  ;;  %v43_v7 = vld [vmem:[%s2615_s2] sm:$0xff]  ;;  %1838 = vmatpush3.msra.mxu1 %v141_v2 }
   0x5   :  { %30 = vst.msk [vmem:[#allocation2 + $0x38] sm:$0xff] %vm22_vm1, %v2128_v6  ;;  %31 = vst.msk [vmem:[#allocation2 + $0x40] sm:$0xff] %vm22_vm1, %v2128_v6  ;;  %1829 = vmatpush3.msra.mxu0 %v45_v1  ;;  %v136_v8 = vld [vmem:[%s2614_s1] sm:$0xff] }
   0x6   :  { %32 = vst.msk [vmem:[#allocation2 + $0x48] sm:$0xff] %vm22_vm1, %v2128_v6  ;;  %33 = vst.msk [vmem:[#allocation2 + $0x50] sm:$0xff] %vm22_vm1, %v2128_v6 }
   0x7   :  { %34 = vst.msk [vmem:[#allocation2 + $0x58] sm:$0xff] %vm22_vm1, %v2128_v6  ;;  %35 = vst.msk [vmem:[#allocation2 + $0x60] sm:$0xff] %vm22_vm1, %v2128_v6 }
   0x8   :  { %36 = vst.msk [vmem:[#allocation2 + $0x68] sm:$0xff] %vm22_vm1, %v2128_v6  ;;  %37 = vst.msk [vmem:[#allocation2 + $0x70] sm:$0xff] %vm22_vm1, %v2128_v6 }
   0x9   :  { %38 = vst.msk [vmem:[#allocation2 + $0x78] sm:$0xff] %vm22_vm1, %v2128_v6  ;;  %39 = vst.msk [vmem:[#allocation2 + $0x80] sm:$0xff] %vm22_vm1, %v2128_v6 }
   0xa   :  { %40 = vst.msk [vmem:[#allocation2 + $0x88] sm:$0xff] %vm22_vm1, %v2128_v6 }
   0xb   :  { %13 = vsyncpa [#allocation6], 0  ;;  %1830 = vmatprep.subr.mxu0 %v44_v4  ;;  %1839 = vmatprep.subr.mxu1 %v140_v5  ;;  %v137_v9 = vld [vmem:[%s2614_s1 + $0x8] sm:$0xff]  ;;  %v138_v11 = vld [vmem:[%s2614_s1 + $0x10] sm:$0xff]  ;;  %vm2129_vm3 = vmmov 0   ;;  %s2132_s9 = smov [#allocation5]  }
   0xc   :  { %1831 = vmatpush3.msra.mxu0 %v44_v4  ;;  %v42_v10 = vld [vmem:[%s2613_s0 + $0x8] sm:$0xff]  ;;  %1840 = vmatpush3.msra.mxu1 %v140_v5  ;;  %v139_v12 = vld [vmem:[%s2614_s1 + $0x18] sm:$0xff]  ;;  %v316_v14 = vld [vmem:[%s2615_s2 + $0x70] sm:$0xff]  ;;  %s1576_s10 = sshll.u32 %s2132_s9, 4  ;;  %vm1525_vm8 = vcmask 122880   ;;  %s1577_s10 = int_to_ptr.vmem [resolvable:$true] %s1576_s10 }
   0xd   :  { %1832 = vmatprep.subr.mxu0 %v43_v7  ;;  %1841 = vmatprep.mubr.msk.f32.mxu1 %vm147_vm2, %v136_v8  ;;  %v317_v13 = vld [vmem:[%s2615_s2 + $0x78] sm:$0xff]  ;;  %v315_v15 = vld [vmem:[%s2615_s2 + $0x68] sm:$0xff]  ;;  %v314_v16 = vld [vmem:[%s2615_s2 + $0x60] sm:$0xff] }
   0xe   :  { %1833 = vmatpush3.msra.mxu0 %v43_v7  ;;  %1842 = vmatmul.mubr.msk.f32.vlgmr.msra.gmra.mxu1 %vm147_vm2, %v137_v9  ;;  %v313_v17 = vld [vmem:[%s2615_s2 + $0x58] sm:$0xff]  ;;  %v312_v18 = vld [vmem:[%s2615_s2 + $0x50] sm:$0xff]  ;;  %v311_v19 = vld [vmem:[%s2615_s2 + $0x48] sm:$0xff] }
   0xf   :  { %1835 = vmatmul.mubr.msk.f32.vlgmr.msra.gmra.mxu0 %vm52_vm0, %v42_v10  ;;  %1844 = vmatprep.mubr.msk.f32.mxu1 %vm147_vm2, %v138_v11  ;;  %v310_v20 = vld [vmem:[%s2615_s2 + $0x40] sm:$0xff]  ;;  %v302_v21 = vld [vmem:[#allocation2 + $0x50] sm:$0xff]  ;;  %v303_v22 = vld [vmem:[#allocation2 + $0x58] sm:$0xff] }
  0x10   :  { %1847 = vmatprep.subr.mxu0 %v317_v13  ;;  %2053 = vmatprep.subr.mxu1 %v317_v13  ;;  %v304_v23 = vld [vmem:[#allocation2 + $0x60] sm:$0xff]  ;;  %v616_v24 = vld [vmem:[%s2615_s2 + $0xb8] sm:$0xff]  ;;  %v305_v25 = vld [vmem:[#allocation2 + $0x68] sm:$0xff] }
  0x11   :  { %1848 = vmatpush3.msra.mxu0 %v317_v13  ;;  %2061 = vmatpush3.msra.mxu1 %v317_v13  ;;  %v306_v26 = vld [vmem:[#allocation2 + $0x70] sm:$0xff]  ;;  %v307_v27 = vld [vmem:[#allocation2 + $0x78] sm:$0xff]  ;;  %v308_v28 = vld [vmem:[#allocation2 + $0x80] sm:$0xff] }
  0x12   :  { %1845 = vmatmul.mubr.msk.f32.gmra.mxu1 %vm147_vm2, %v139_v12  ;;  %1849 = vmatprep.subr.mxu0 %v316_v14  ;;  %v309_v29 = vld [vmem:[#allocation2 + $0x88] sm:$0xff]  ;;  %v1595_v30 = vld [vmem:[%s2616_s3 + $0x1] ss:$0 sm:$0xff]  ;;  %v1592_v31 = vld [vmem:[%s2616_s3] ss:$0 sm:$0xff] }
  0x13   :  { %2054 = vmatprep.subr.mxu1 %v316_v14  ;;  %1850 = vmatpush3.msra.mxu0 %v316_v14  ;;  %v615_v53 = vld [vmem:[%s2615_s2 + $0xb0] sm:$0xff]  ;;  %v614_v54 = vld [vmem:[%s2615_s2 + $0xa8] sm:$0xff]  ;;  %v613_v57 = vld [vmem:[%s2615_s2 + $0xa0] sm:$0xff] }
  0x14   :  { %2062 = vmatpush3.msra.mxu1 %v316_v14  ;;  %1851 = vmatprep.subr.mxu0 %v315_v15  ;;  %v612_v58 = vld [vmem:[%s2615_s2 + $0x98] sm:$0xff]  ;;  %v298_v59 = vld [vmem:[#allocation2 + $0x30] sm:$0xff]  ;;  %v300_v62 = vld [vmem:[#allocation2 + $0x40] sm:$0xff] }
  0x15   :  { %2055 = vmatprep.subr.mxu1 %v315_v15  ;;  %1852 = vmatpush3.msra.mxu0 %v315_v15  ;;  %v299_v61 = vld [vmem:[#allocation2 + $0x38] sm:$0xff]  ;;  %v301_v63 = vld [vmem:[#allocation2 + $0x48] sm:$0xff]  ;;  %v611_v0 = vld [vmem:[%s2615_s2 + $0x90] sm:$0xff] }
  0x16   :  { %2063 = vmatpush3.msra.mxu1 %v315_v15  ;;  %1853 = vmatprep.subr.mxu0 %v314_v16  ;;  %v610_v1 = vld [vmem:[%s2615_s2 + $0x88] sm:$0xff]  ;;  %v609_v2 = vld [vmem:[%s2615_s2 + $0x80] sm:$0xff]  ;;  %v879_v3 = vld [vmem:[%s2615_s2 + $0xf8] sm:$0xff] }
  0x17   :  { %2056 = vmatprep.subr.mxu1 %v314_v16  ;;  %1854 = vmatpush3.msra.mxu0 %v314_v16  ;;  %v878_v4 = vld [vmem:[%s2615_s2 + $0xf0] sm:$0xff]  ;;  %v877_v5 = vld [vmem:[%s2615_s2 + $0xe8] sm:$0xff]  ;;  %v876_v7 = vld [vmem:[%s2615_s2 + $0xe0] sm:$0xff] }
  0x18   :  { %2064 = vmatpush3.msra.mxu1 %v314_v16  ;;  %1855 = vmatprep.subr.mxu0 %v313_v17  ;;  %v875_v8 = vld [vmem:[%s2615_s2 + $0xd8] sm:$0xff]  ;;  %v1600_v10 = vld [vmem:[%s2616_s3 + $0x2] ss:$0 sm:$0xff]  ;;  %v1601_v16 = vld [vmem:[%s2616_s3 + $0x3] ss:$0 sm:$0xff] }
  0x19   :  { %2057 = vmatprep.subr.mxu1 %v313_v17  ;;  %1856 = vmatpush3.msra.mxu0 %v313_v17 }
  0x1a   :  { %2065 = vmatpush3.msra.mxu1 %v313_v17  ;;  %1857 = vmatprep.subr.mxu0 %v312_v18 }
  0x1b   :  { %2058 = vmatprep.subr.mxu1 %v312_v18  ;;  %1858 = vmatpush3.msra.mxu0 %v312_v18 }
  0x1c   :  { %2066 = vmatpush3.msra.mxu1 %v312_v18  ;;  %1859 = vmatprep.subr.mxu0 %v311_v19 }
  0x1d   :  { %2059 = vmatprep.subr.mxu1 %v311_v19  ;;  %1860 = vmatpush3.msra.mxu0 %v311_v19 }
  0x1e   :  { %2067 = vmatpush3.msra.mxu1 %v311_v19  ;;  %1861 = vmatprep.subr.mxu0 %v310_v20 }
  0x1f   :  { %2060 = vmatprep.subr.mxu1 %v310_v20  ;;  %1862 = vmatpush3.msra.mxu0 %v310_v20 }
  0x20   :  { %2068 = vmatpush3.msra.mxu1 %v310_v20  ;;  %1878 = vmatprep.mubr.msk.f32.mxu1 %vm22_vm1, %v302_v21 }
  0x21   :  { %1879 = vmatmul.mubr.msk.f32.vlgmr.msra.gmra.mxu1 %vm22_vm1, %v303_v22  ;;  %1890 = vmatprep.subr.mxu0 %v616_v24 }
  0x22   :  { %1881 = vmatprep.mubr.msk.f32.mxu1 %vm22_vm1, %v304_v23  ;;  %1933 = vmatprep.subr.mxu1 %v879_v3 }
  0x23   :  { %1934 = vmatpush3.msra.mxu1 %v879_v3  ;;  %v872_v3 = vld [vmem:[%s2615_s2 + $0xc0] sm:$0xff] }
  0x24   :  { %1935 = vmatprep.subr.mxu1 %v878_v4 }
  0x25   :  { %1882 = vmatmul.mubr.msk.f32.gmra.mxu1 %vm22_vm1, %v305_v25 }
  0x26   :  { %1884 = vmatprep.mubr.msk.f32.mxu1 %vm22_vm1, %v306_v26  ;;  %1936 = vmatpush3.msra.mxu1 %v878_v4  ;;  %v1620_v4 = vld [vmem:[%s2616_s3 + $0x4] ss:$0 sm:$0xff] }
  0x27   :  { %1937 = vmatprep.subr.mxu1 %v877_v5 }
  0x28   :  { %1938 = vmatpush3.msra.mxu1 %v877_v5 }
  0x29   :  { %1885 = vmatmul.mubr.msk.f32.gmra.mxu1 %vm22_vm1, %v307_v27  ;;  %1939 = vmatprep.subr.mxu1 %v876_v7 }
  0x2a   :  { %1887 = vmatprep.mubr.msk.f32.mxu1 %vm22_vm1, %v308_v28  ;;  %1940 = vmatpush3.msra.mxu1 %v876_v7 }
  0x2b   :  { %1941 = vmatprep.subr.mxu1 %v875_v8 }
  0x2c   :  { %1942 = vmatpush3.msra.mxu1 %v875_v8 }
  0x2d   :  { %1888 = vmatmul.mubr.msk.f32.gmra.mxu1 %vm22_vm1, %v309_v29 }
  0xce   :  { %v1843_v32 = vpop.f32.mrf.mxu1 }
  0xcf   :  { %v1836_v33 = vpop.f32.mrf.mxu0  ;;  %v232_v34 = vadd.f32 %v1843_v32, %v1595_v30 }
  0xd0   :  { %v131_v35 = vadd.f32 %v1836_v33, %v1592_v31  ;;  %v226_v36 = vpop.f32.mrf.mxu1 }
  0xd1   :  { %v125_v37 = vpop.f32.mrf.mxu0  ;;  %v246_v38 = vmax.f32 %v232_v34, 0.0  ;;  %v227_v39 = vadd.f32 %v1595_v30, %v226_v36 }
  0xd2   :  { %v135_v40 = vmax.f32 %v131_v35, 0.0  ;;  %v126_v41 = vadd.f32 %v1592_v31, %v125_v37  ;;  %v1846_v42 = vpop.f32.mrf.mxu1 }
  0xd3   :  { %252 = vst.msk [vmem:[#allocation2 + $0x18] sm:$0xff] %vm22_vm1, %v246_v38  ;;  %v245_v43 = vmax.f32 %v227_v39, 0.0  ;;  %v242_v44 = vadd.f32 %v1846_v42, %v1595_v30 }
  0xd4   :  { %250 = vst.msk [vmem:[#allocation2 + $0x8] sm:$0xff] %vm22_vm1, %v135_v40  ;;  %v134_v45 = vmax.f32 %v126_v41, 0.0  ;;  %v236_v46 = vpop.f32.mrf.mxu1 }
  0xd5   :  { %251 = vst.msk [vmem:[#allocation2 + $0x10] sm:$0xff] %vm22_vm1, %v245_v43  ;;  %v248_v47 = vmax.f32 %v242_v44, 0.0  ;;  %v237_v48 = vadd.f32 %v1595_v30, %v236_v46 }
  0xd6   :  { %249 = vst.msk [vmem:[#allocation2] sm:$0xff] %vm22_vm1, %v134_v45 }
  0xd7   :  { %254 = vst.msk [vmem:[#allocation2 + $0x28] sm:$0xff] %vm22_vm1, %v248_v47  ;;  %v247_v49 = vmax.f32 %v237_v48, 0.0 }
  0xd9   :  { %253 = vst.msk [vmem:[#allocation2 + $0x20] sm:$0xff] %vm22_vm1, %v247_v49 }
  0xda   :  { %v295_v56 = vld [vmem:[#allocation2 + $0x18] sm:$0xff] }
  0xdb   :  { %v293_v52 = vld [vmem:[#allocation2 + $0x8] sm:$0xff] }
  0xdc   :  { %v294_v51 = vld [vmem:[#allocation2 + $0x10] sm:$0xff] }
  0xdd   :  { %v292_v50 = vld [vmem:[#allocation2] sm:$0xff] }
  0xde   :  { %1863 = vmatprep.mubr.msk.f32.mxu0 %vm22_vm1, %v292_v50  ;;  %v297_v60 = vld [vmem:[#allocation2 + $0x28] sm:$0xff] }
  0xdf   :  { %1864 = vmatmul.mubr.msk.f32.vlgmr.msra.gmra.mxu0 %vm22_vm1, %v293_v52 }
  0xe0   :  { %1866 = vmatprep.mubr.msk.f32.mxu0 %vm22_vm1, %v294_v51  ;;  %1891 = vmatpush3.msra.mxu0 %v616_v24  ;;  %v296_v55 = vld [vmem:[#allocation2 + $0x20] sm:$0xff] }
  0xe1   :  { %1892 = vmatprep.subr.mxu0 %v615_v53  ;;  %v1880_v9 = vpop.f32.mrf.mxu1 }
  0xe2   :  { %1893 = vmatpush3.msra.mxu0 %v615_v53  ;;  %v558_v50 = vadd.f32 %v1880_v9, %v1601_v16 }
  0xe3   :  { %1867 = vmatmul.mubr.msk.f32.gmra.mxu0 %vm22_vm1, %v295_v56  ;;  %1894 = vmatprep.subr.mxu0 %v614_v54  ;;  %v552_v14 = vpop.f32.mrf.mxu1 }
  0xe4   :  { %1869 = vmatprep.mubr.msk.f32.mxu0 %vm22_vm1, %v296_v55  ;;  %1895 = vmatpush3.msra.mxu0 %v614_v54  ;;  %v553_v40 = vadd.f32 %v1601_v16, %v552_v14  ;;  %v602_v54 = vmax.f32 %v558_v50, 0.0 }
  0xe5   :  { %1896 = vmatprep.subr.mxu0 %v613_v57  ;;  %v1883_v22 = vpop.f32.mrf.mxu1 }
  0xe6   :  { %1897 = vmatpush3.msra.mxu0 %v613_v57  ;;  %v601_v47 = vmax.f32 %v553_v40, 0.0  ;;  %v568_v55 = vadd.f32 %v1883_v22, %v1601_v16 }
  0xe7   :  { %1870 = vmatmul.mubr.msk.f32.gmra.mxu0 %vm22_vm1, %v297_v60  ;;  %1898 = vmatprep.subr.mxu0 %v612_v58  ;;  %v562_v29 = vpop.f32.mrf.mxu1 }
  0xe8   :  { %1872 = vmatprep.mubr.msk.f32.mxu0 %vm22_vm1, %v298_v59  ;;  %1899 = vmatpush3.msra.mxu0 %v612_v58  ;;  %v563_v48 = vadd.f32 %v1601_v16, %v562_v29  ;;  %v604_v59 = vmax.f32 %v568_v55, 0.0 }
  0xe9   :  { %1900 = vmatprep.subr.mxu0 %v611_v0  ;;  %v1886_v36 = vpop.f32.mrf.mxu1 }
  0xea   :  { %1901 = vmatpush3.msra.mxu0 %v611_v0  ;;  %v603_v52 = vmax.f32 %v563_v48, 0.0  ;;  %v578_v60 = vadd.f32 %v1886_v36, %v1601_v16 }
  0xeb   :  { %1873 = vmatmul.mubr.msk.f32.gmra.mxu0 %vm22_vm1, %v299_v61  ;;  %1902 = vmatprep.subr.mxu0 %v610_v1  ;;  %v572_v44 = vpop.f32.mrf.mxu1 }
  0xec   :  { %1875 = vmatprep.mubr.msk.f32.mxu0 %vm22_vm1, %v300_v62  ;;  %1903 = vmatpush3.msra.mxu0 %v610_v1  ;;  %v573_v53 = vadd.f32 %v1601_v16, %v572_v44  ;;  %v606_v62 = vmax.f32 %v578_v60, 0.0  ;;  %v874_v1 = vld [vmem:[%s2615_s2 + $0xd0] sm:$0xff] }
  0xed   :  { %1904 = vmatprep.subr.mxu0 %v609_v2  ;;  %v1889_v51 = vpop.f32.mrf.mxu1  ;;  %1943 = vmatprep.subr.mxu1 %v874_v1 }
  0xee   :  { %1905 = vmatpush3.msra.mxu0 %v609_v2  ;;  %v605_v57 = vmax.f32 %v573_v53, 0.0  ;;  %1944 = vmatpush3.msra.mxu1 %v874_v1  ;;  %v873_v2 = vld [vmem:[%s2615_s2 + $0xc8] sm:$0xff] }
  0xef   :  { %1876 = vmatmul.mubr.msk.f32.gmra.mxu0 %vm22_vm1, %v301_v63  ;;  %2018 = vmatprep.subr.mxu0 %v2128_v6  ;;  %v582_v56 = vpop.f32.mrf.mxu1  ;;  %v588_v63 = vadd.f32 %v1889_v51, %v1601_v16 }
  0xf0   :  { %v583_v58 = vadd.f32 %v1601_v16, %v582_v56  ;;  %1945 = vmatprep.subr.mxu1 %v873_v2 }
  0xf1   :  { %v608_v0 = vmax.f32 %v588_v63, 0.0  ;;  %1946 = vmatpush3.msra.mxu1 %v873_v2 }
  0xf2   :  { %v607_v61 = vmax.f32 %v583_v58, 0.0  ;;  %1947 = vmatprep.subr.mxu1 %v872_v3 }
  0xf3   :  { %1948 = vmatpush3.msra.mxu1 %v872_v3  ;;  %v2412_v3 = vld [vmem:[%s2616_s3 + $0x7] ss:$0 sm:$0xff] }
 0x19f   :  { %v1865_v11 = vpop.f32.mrf.mxu0 }
 0x1a0   :  { %v508_v12 = vadd.f32 %v1865_v11, %v1600_v10 }
 0x1a1   :  { %v502_v13 = vpop.f32.mrf.mxu0 }
 0x1a2   :  { %v503_v15 = vadd.f32 %v1600_v10, %v502_v13  ;;  %v592_v19 = vmax.f32 %v508_v12, 0.0  ;;  %v1621_v10 = vld [vmem:[%s2616_s3 + $0x5] ss:$0 sm:$0xff] }
 0x1a3   :  { %v1868_v17 = vpop.f32.mrf.mxu0 }
 0x1a4   :  { %v591_v18 = vmax.f32 %v503_v15, 0.0  ;;  %v518_v20 = vadd.f32 %v1868_v17, %v1601_v16 }
 0x1a5   :  { %v512_v21 = vpop.f32.mrf.mxu0 }
 0x1a6   :  { %v513_v23 = vadd.f32 %v1601_v16, %v512_v21  ;;  %1906 = vmatprep.mubr.msk.f32.mxu0 %vm22_vm1, %v591_v18  ;;  %v594_v26 = vmax.f32 %v518_v20, 0.0 }
 0x1a7   :  { %v1871_v24 = vpop.f32.mrf.mxu0  ;;  %1907 = vmatmul.mubr.msk.f32.vlgmr.msra.gmra.mxu0 %vm22_vm1, %v592_v19 }
 0x1a8   :  { %v593_v25 = vmax.f32 %v513_v23, 0.0  ;;  %v528_v27 = vadd.f32 %v1871_v24, %v1601_v16 }
 0x1a9   :  { %v522_v28 = vpop.f32.mrf.mxu0 }
 0x1aa   :  { %v523_v30 = vadd.f32 %v1601_v16, %v522_v28  ;;  %1909 = vmatprep.mubr.msk.f32.mxu0 %vm22_vm1, %v593_v25  ;;  %v596_v33 = vmax.f32 %v528_v27, 0.0 }
 0x1ab   :  { %v1874_v31 = vpop.f32.mrf.mxu0  ;;  %1910 = vmatmul.mubr.msk.f32.gmra.mxu0 %vm22_vm1, %v594_v26 }
 0x1ac   :  { %v595_v32 = vmax.f32 %v523_v30, 0.0  ;;  %v538_v34 = vadd.f32 %v1874_v31, %v1601_v16 }
 0x1ad   :  { %v532_v35 = vpop.f32.mrf.mxu0 }
 0x1ae   :  { %v533_v37 = vadd.f32 %v1601_v16, %v532_v35  ;;  %1912 = vmatprep.mubr.msk.f32.mxu0 %vm22_vm1, %v595_v32  ;;  %v598_v41 = vmax.f32 %v538_v34, 0.0 }
 0x1af   :  { %v1877_v38 = vpop.f32.mrf.mxu0  ;;  %1913 = vmatmul.mubr.msk.f32.gmra.mxu0 %vm22_vm1, %v596_v33 }
 0x1b0   :  { %v597_v39 = vmax.f32 %v533_v37, 0.0  ;;  %v548_v42 = vadd.f32 %v1877_v38, %v1601_v16 }
 0x1b1   :  { %v542_v43 = vpop.f32.mrf.mxu0 }
 0x1b2   :  { %v543_v45 = vadd.f32 %v1601_v16, %v542_v43  ;;  %1915 = vmatprep.mubr.msk.f32.mxu0 %vm22_vm1, %v597_v39  ;;  %v600_v49 = vmax.f32 %v548_v42, 0.0 }
 0x1b3   :  { %1916 = vmatmul.mubr.msk.f32.gmra.mxu0 %vm22_vm1, %v598_v41 }
 0x1b4   :  { %v599_v46 = vmax.f32 %v543_v45, 0.0 }
 0x1b6   :  { %1918 = vmatprep.mubr.msk.f32.mxu0 %vm22_vm1, %v599_v46 }
 0x1b7   :  { %1919 = vmatmul.mubr.msk.f32.gmra.mxu0 %vm22_vm1, %v600_v49 }
 0x1b8   :  { %1921 = vmatprep.mubr.msk.f32.mxu0 %vm22_vm1, %v601_v47 }
 0x1bb   :  { %1922 = vmatmul.mubr.msk.f32.gmra.mxu0 %vm22_vm1, %v602_v54 }
 0x1bc   :  { %1924 = vmatprep.mubr.msk.f32.mxu0 %vm22_vm1, %v603_v52 }
 0x1bf   :  { %1925 = vmatmul.mubr.msk.f32.gmra.mxu0 %vm22_vm1, %v604_v59 }
 0x1c0   :  { %1927 = vmatprep.mubr.msk.f32.mxu0 %vm22_vm1, %v605_v57 }
 0x1c3   :  { %1928 = vmatmul.mubr.msk.f32.gmra.mxu0 %vm22_vm1, %v606_v62  ;;  %v1640_v62 = vld [vmem:[%s2616_s3 + $0x6] ss:$0 sm:$0xff]  ;;  %s2131_s3 = smov [#allocation3]  }
 0x1c4   :  { %1930 = vmatprep.mubr.msk.f32.mxu0 %vm22_vm1, %v607_v61  ;;  %v1264_v61 = vlaneseq  ;;  %s1563_s30 = sshll.u32 %s2131_s3, 4  ;;  %s1564_s30 = int_to_ptr.vmem [resolvable:$true] %s1563_s30 }
 0x1c5   :  { %s2084_s11 = scalar_lea.vmem %s1564_s30, 256  ;;  %p2089_p1 = scmp.lt.s32.totalorder %s1564_s30, %s1564_s30 }
 0x1c6   :  { %v2407_v1 = vand.u32 127, %v1264_v61  ;;  %p2085_p0 = scmp.ne.s32.totalorder %s1564_s30, %s2084_s11  ;;  %p2090_p2 = scmp.lt.s32.totalorder %s2084_s11, %s2084_s11 }
 0x1c7   :  { %1931 = vmatmul.mubr.msk.f32.gmra.mxu0 %vm22_vm1, %v608_v0 }
 0x1c8   :  { %2050 = vmatprep.mubr.msk.f32.mxu0 %vm2129_vm3, %v2128_v6  ;;  %vm1266_vm4 = vcmp.lt.s32.totalorder %v2407_v1, 10  ;;  %p2091_p3 = por %p2090_p2, %p2089_p1 }
 0x1ca   :  { %p2092_p4 = pnand %p2091_p3, %p2085_p0 }
 0x267   :  { %v1908_v5 = vpop.f32.mrf.mxu0 }
 0x268   :  { %v771_v7 = vadd.f32 %v1908_v5, %v1620_v4 }
 0x269   :  { %v765_v8 = vpop.f32.mrf.mxu0 }
 0x26a   :  { %v766_v9 = vadd.f32 %v1620_v4, %v765_v8  ;;  %v855_v13 = vmax.f32 %v771_v7, 0.0 }
 0x26b   :  { %v1911_v11 = vpop.f32.mrf.mxu0 }
 0x26c   :  { %v854_v12 = vmax.f32 %v766_v9, 0.0  ;;  %v781_v14 = vadd.f32 %v1911_v11, %v1621_v10 }
 0x26d   :  { %v775_v15 = vpop.f32.mrf.mxu0 }
 0x26e   :  { %v776_v16 = vadd.f32 %v1621_v10, %v775_v15  ;;  %1949 = vmatprep.mubr.msk.f32.mxu1 %vm22_vm1, %v854_v12  ;;  %v857_v19 = vmax.f32 %v781_v14, 0.0 }
 0x26f   :  { %v1914_v17 = vpop.f32.mrf.mxu0  ;;  %1950 = vmatmul.mubr.msk.f32.vlgmr.msra.gmra.mxu1 %vm22_vm1, %v855_v13 }
 0x270   :  { %v856_v18 = vmax.f32 %v776_v16, 0.0  ;;  %v791_v20 = vadd.f32 %v1914_v17, %v1621_v10 }
 0x271   :  { %v785_v21 = vpop.f32.mrf.mxu0 }
 0x272   :  { %v786_v22 = vadd.f32 %v1621_v10, %v785_v21  ;;  %1952 = vmatprep.mubr.msk.f32.mxu1 %vm22_vm1, %v856_v18  ;;  %v859_v25 = vmax.f32 %v791_v20, 0.0 }
 0x273   :  { %v1917_v23 = vpop.f32.mrf.mxu0  ;;  %1953 = vmatmul.mubr.msk.f32.gmra.mxu1 %vm22_vm1, %v857_v19 }
 0x274   :  { %v858_v24 = vmax.f32 %v786_v22, 0.0  ;;  %v801_v26 = vadd.f32 %v1917_v23, %v1621_v10 }
 0x275   :  { %v795_v27 = vpop.f32.mrf.mxu0 }
 0x276   :  { %v796_v28 = vadd.f32 %v1621_v10, %v795_v27  ;;  %1955 = vmatprep.mubr.msk.f32.mxu1 %vm22_vm1, %v858_v24  ;;  %v861_v31 = vmax.f32 %v801_v26, 0.0 }
 0x277   :  { %v1920_v29 = vpop.f32.mrf.mxu0  ;;  %1956 = vmatmul.mubr.msk.f32.gmra.mxu1 %vm22_vm1, %v859_v25 }
 0x278   :  { %v860_v30 = vmax.f32 %v796_v28, 0.0  ;;  %v811_v32 = vadd.f32 %v1920_v29, %v1621_v10 }
 0x279   :  { %v805_v33 = vpop.f32.mrf.mxu0 }
 0x27a   :  { %v806_v34 = vadd.f32 %v1621_v10, %v805_v33  ;;  %1958 = vmatprep.mubr.msk.f32.mxu1 %vm22_vm1, %v860_v30  ;;  %v863_v37 = vmax.f32 %v811_v32, 0.0 }
 0x27b   :  { %v1923_v35 = vpop.f32.mrf.mxu0  ;;  %1959 = vmatmul.mubr.msk.f32.gmra.mxu1 %vm22_vm1, %v861_v31 }
 0x27c   :  { %v862_v36 = vmax.f32 %v806_v34, 0.0  ;;  %v821_v38 = vadd.f32 %v1923_v35, %v1621_v10 }
 0x27d   :  { %v815_v39 = vpop.f32.mrf.mxu0 }
 0x27e   :  { %v816_v40 = vadd.f32 %v1621_v10, %v815_v39  ;;  %1961 = vmatprep.mubr.msk.f32.mxu1 %vm22_vm1, %v862_v36  ;;  %v865_v43 = vmax.f32 %v821_v38, 0.0 }
 0x27f   :  { %v1926_v41 = vpop.f32.mrf.mxu0  ;;  %1962 = vmatmul.mubr.msk.f32.gmra.mxu1 %vm22_vm1, %v863_v37 }
 0x280   :  { %v864_v42 = vmax.f32 %v816_v40, 0.0  ;;  %v831_v44 = vadd.f32 %v1926_v41, %v1621_v10 }
 0x281   :  { %v825_v45 = vpop.f32.mrf.mxu0 }
 0x282   :  { %v826_v46 = vadd.f32 %v1621_v10, %v825_v45  ;;  %1964 = vmatprep.mubr.msk.f32.mxu1 %vm22_vm1, %v864_v42  ;;  %v867_v49 = vmax.f32 %v831_v44, 0.0 }
 0x283   :  { %v1929_v47 = vpop.f32.mrf.mxu0  ;;  %1965 = vmatmul.mubr.msk.f32.gmra.mxu1 %vm22_vm1, %v865_v43 }
 0x284   :  { %v866_v48 = vmax.f32 %v826_v46, 0.0  ;;  %v841_v50 = vadd.f32 %v1929_v47, %v1621_v10 }
 0x285   :  { %v835_v51 = vpop.f32.mrf.mxu0 }
 0x286   :  { %v836_v52 = vadd.f32 %v1621_v10, %v835_v51  ;;  %1967 = vmatprep.mubr.msk.f32.mxu1 %vm22_vm1, %v866_v48  ;;  %v869_v55 = vmax.f32 %v841_v50, 0.0 }
 0x287   :  { %v1932_v53 = vpop.f32.mrf.mxu0  ;;  %1968 = vmatmul.mubr.msk.f32.gmra.mxu1 %vm22_vm1, %v867_v49 }
 0x288   :  { %v868_v54 = vmax.f32 %v836_v52, 0.0  ;;  %v851_v56 = vadd.f32 %v1932_v53, %v1621_v10 }
 0x289   :  { %v845_v57 = vpop.f32.mrf.mxu0 }
 0x28a   :  { %v846_v58 = vadd.f32 %v1621_v10, %v845_v57  ;;  %1970 = vmatprep.mubr.msk.f32.mxu1 %vm22_vm1, %v868_v54  ;;  %v871_v60 = vmax.f32 %v851_v56, 0.0 }
 0x28b   :  { %1971 = vmatmul.mubr.msk.f32.gmra.mxu1 %vm22_vm1, %v869_v55 }
 0x28c   :  { %v870_v59 = vmax.f32 %v846_v58, 0.0 }
 0x28e   :  { %1973 = vmatprep.mubr.msk.f32.mxu1 %vm22_vm1, %v870_v59 }
 0x28f   :  { %1974 = vmatmul.mubr.msk.f32.gmra.mxu1 %vm22_vm1, %v871_v60 }
 0x32f   :  { %v1951_v63 = vpop.f32.mrf.mxu1 }
 0x330   :  { %v2404_v0 = vadd.f32 %v1951_v63, %v1640_v62 }
 0x331   :  { %v1028_v2 = vpop.f32.mrf.mxu1 }
 0x332   :  { %v1118_v4 = vmax.f32 %v2404_v0, 0.0  ;;  %v1029_v5 = vadd.f32 %v1640_v62, %v1028_v2 }
 0x333   :  { %v1954_v7 = vpop.f32.mrf.mxu1 }
 0x334   :  { %v1268_v8 = vmax.f32 %v1118_v4, 1e-07  ;;  %v1117_v9 = vmax.f32 %v1029_v5, 0.0  ;;  %v1044_v10 = vadd.f32 %v1954_v7, %v2412_v3 }
 0x335   :  { %v1038_v11 = vpop.f32.mrf.mxu1 }
 0x336   :  { %v1267_v12 = vmax.f32 %v1117_v9, 1e-07  ;;  %v2419_v13 = vmax.f32 %v1044_v10, 0.0  ;;  %v1039_v14 = vadd.f32 %v2412_v3, %v1038_v11  ;;  %2008 = vmatprep.mubr.msk.f32.mxu1 %vm22_vm1, %v1117_v9  ;;  %v1286_v16 = vsel %vm1266_vm4, %v1268_v8, 0.0 }
 0x337   :  { %v1957_v15 = vpop.f32.mrf.mxu1  ;;  %v2445_v29 = vmul.f32 %v1286_v16, %v1286_v16 }
 0x338   :  { %v1270_v17 = vmax.f32 %v2419_v13, 1e-07  ;;  %v2426_v18 = vmax.f32 %v1039_v14, 0.0  ;;  %v1054_v19 = vadd.f32 %v1957_v15, %v2412_v3  ;;  %v1285_v20 = vsel %vm1266_vm4, %v1267_v12, 0.0 }
 0x339   :  { %v1048_v21 = vpop.f32.mrf.mxu1  ;;  %v2431_v22 = vmul.f32 %v1285_v20, %v1285_v20  ;;  %v1538_v37 = vsel %vm22_vm1, %v2445_v29, 0.0 }
 0x33a   :  { %v2435_v23 = vsel %vm1266_vm4, %v1270_v17, 0.0  ;;  %v1269_v24 = vmax.f32 %v2426_v18, 1e-07  ;;  %v2438_v25 = vmax.f32 %v1054_v19, 0.0  ;;  %v1049_v26 = vadd.f32 %v2412_v3, %v1048_v21 }
 0x33b   :  { %v2441_v27 = vpop.f32.mrf.mxu1  ;;  %v1535_v28 = vsel %vm22_vm1, %v2431_v22, 0.0 }
 0x33c   :  { %v2449_v30 = vsel %vm1266_vm4, %v1269_v24, 0.0  ;;  %v1272_v31 = vmax.f32 %v2438_v25, 1e-07  ;;  %v2452_v32 = vmax.f32 %v1049_v26, 0.0  ;;  %1536 = vadd.xlane.f32.xlu0 %v1535_v28 }
 0x33d   :  { %v2454_v33 = vpop.f32.mrf.mxu1 }
 0x33e   :  { %v2458_v34 = vsel %vm1266_vm4, %v1272_v31, 0.0  ;;  %v1271_v35 = vmax.f32 %v2452_v32, 1e-07 }
 0x33f   :  { %v2461_v36 = vpop.f32.mrf.mxu1  ;;  %v1308_v1 = vmul.f32 %v2458_v34, %v2458_v34 }
 0x340   :  { %v2467_v38 = vsel %vm1266_vm4, %v1271_v35, 0.0  ;;  %1539 = vadd.xlane.f32.xlu0 %v1538_v37  ;;  %v1074_v26 = vadd.f32 %v2461_v36, %v2412_v3 }
 0x341   :  { %v2469_v39 = vpop.f32.mrf.mxu1 }
 0x343   :  { %v1966_v40 = vpop.f32.mrf.mxu1 }
 0x344   :  { %v1084_v11 = vadd.f32 %v1966_v40, %v2412_v3  ;;  %v1126_v40 = vmax.f32 %v1074_v26, 0.0 }
 0x345   :  { %v1078_v41 = vpop.f32.mrf.mxu1 }
 0x346   :  { %v1128_v17 = vmax.f32 %v1084_v11, 0.0  ;;  %v1079_v19 = vadd.f32 %v2412_v3, %v1078_v41  ;;  %v1069_v41 = vadd.f32 %v2412_v3, %v2469_v39 }
 0x347   :  { %v1969_v42 = vpop.f32.mrf.mxu1 }
 0x348   :  { %v1094_v59 = vadd.f32 %v1969_v42, %v2412_v3  ;;  %v1278_v28 = vmax.f32 %v1128_v17, 1e-07  ;;  %v1127_v31 = vmax.f32 %v1079_v19, 0.0 }
 0x349   :  { %v1088_v43 = vpop.f32.mrf.mxu1 }
 0x34a   :  { %v1130_v5 = vmax.f32 %v1094_v59, 0.0  ;;  %v1089_v7 = vadd.f32 %v2412_v3, %v1088_v43  ;;  %v1296_v36 = vsel %vm1266_vm4, %v1278_v28, 0.0  ;;  %v1277_v42 = vmax.f32 %v1127_v31, 1e-07 }
 0x34b   :  { %v1972_v44 = vpop.f32.mrf.mxu1  ;;  %v1314_v43 = vmul.f32 %v1296_v36, %v1296_v36  ;;  %v1547_v59 = vshrl.u32 %v1264_v61, 7 }
 0x34c   :  { %v1104_v47 = vadd.f32 %v1972_v44, %v2412_v3  ;;  %v1280_v12 = vmax.f32 %v1130_v5, 1e-07  ;;  %v1129_v14 = vmax.f32 %v1089_v7, 0.0  ;;  %v1064_v44 = vadd.f32 %v2441_v27, %v2412_v3 }
 0x34d   :  { %v1098_v45 = vpop.f32.mrf.mxu1  ;;  %v1295_v39 = vsel %vm1266_vm4, %v1277_v42, 0.0 }
 0x34e   :  { %v1132_v52 = vmax.f32 %v1104_v47, 0.0  ;;  %v1099_v53 = vadd.f32 %v2412_v3, %v1098_v45  ;;  %v1298_v20 = vsel %vm1266_vm4, %v1280_v12, 0.0  ;;  %v1279_v21 = vmax.f32 %v1129_v14, 1e-07 }
 0x34f   :  { %v1975_v46 = vpop.f32.mrf.mxu1  ;;  %v1316_v24 = vmul.f32 %v1298_v20, %v1298_v20  ;;  %v1276_v45 = vmax.f32 %v1126_v40, 1e-07  ;;  %v1313_v47 = vmul.f32 %v1295_v39, %v1295_v39 }
 0x350   :  { %v1114_v48 = vadd.f32 %v1975_v46, %v2412_v3  ;;  %v1282_v60 = vmax.f32 %v1132_v52, 1e-07  ;;  %v1131_v62 = vmax.f32 %v1099_v53, 0.0  ;;  %v1297_v35 = vsel %vm1266_vm4, %v1279_v21, 0.0 }
 0x351   :  { %v1108_v49 = vpop.f32.mrf.mxu1  ;;  %v1315_v37 = vmul.f32 %v1297_v35, %v1297_v35  ;;  %v1125_v46 = vmax.f32 %v1069_v41, 0.0  ;;  %v1294_v27 = vsel %vm1266_vm4, %v1276_v45, 0.0 }
 0x352   :  { %v1134_v50 = vmax.f32 %v1114_v48, 0.0  ;;  %v1109_v51 = vadd.f32 %v2412_v3, %v1108_v49  ;;  %v1300_v8 = vsel %vm1266_vm4, %v1282_v60, 0.0  ;;  %v1281_v9 = vmax.f32 %v1131_v62, 1e-07 }
 0x353   :  { %v1318_v10 = vmul.f32 %v1300_v8, %v1300_v8  ;;  %v1124_v48 = vmax.f32 %v1064_v44, 0.0  ;;  %v1059_v49 = vadd.f32 %v2412_v3, %v2454_v33  ;;  %v1548_v60 = vsub.s32 0, %v1547_v59 }
 0x354   :  { %v1284_v54 = vmax.f32 %v1134_v50, 1e-07  ;;  %v1133_v55 = vmax.f32 %v1109_v51, 0.0  ;;  %1976 = vmatprep.subr.msk.mxu1 %vm22_vm1, %v1134_v50  ;;  %v1299_v15 = vsel %vm1266_vm4, %v1281_v9, 0.0  ;;  %v1312_v51 = vmul.f32 %v1294_v27, %v1294_v27 }
 0x355   :  { %1977 = vmatpush3.xpose.msk.msra.mxu1 %vm22_vm1, %v1134_v50  ;;  %v1317_v16 = vmul.f32 %v1299_v15, %v1299_v15  ;;  %v1275_v50 = vmax.f32 %v1125_v46, 1e-07  ;;  %v1123_v53 = vmax.f32 %v1059_v49, 0.0 }
 0x356   :  { %v1302_v56 = vsel %vm1266_vm4, %v1284_v54, 0.0  ;;  %v1283_v57 = vmax.f32 %v1133_v55, 1e-07  ;;  %1978 = vmatprep.subr.msk.mxu1 %vm22_vm1, %v1133_v55 }
 0x357   :  { %v1320_v58 = vmul.f32 %v1302_v56, %v1302_v56  ;;  %v1293_v54 = vsel %vm1266_vm4, %v1275_v50, 0.0 }
 0x358   :  { %v1301_v63 = vsel %vm1266_vm4, %v1283_v57, 0.0  ;;  %v1311_v3 = vmul.f32 %v1293_v54, %v1293_v54 }
 0x359   :  { %1979 = vmatpush3.xpose.msk.msra.mxu1 %vm22_vm1, %v1133_v55  ;;  %2019 = vmatpush3.xpose.msk.msra.mxu0 %vm22_vm1, %v1320_v58  ;;  %v1319_v2 = vmul.f32 %v1301_v63, %v1301_v63  ;;  %v1273_v55 = vmax.f32 %v1123_v53, 1e-07 }
 0x35a   :  { %1980 = vmatprep.subr.msk.mxu1 %vm22_vm1, %v1132_v52  ;;  %2020 = vmatprep.subr.mxu0 %v2128_v6 }
 0x35b   :  { %v1291_v57 = vsel %vm1266_vm4, %v1273_v55, 0.0 }
 0x35c   :  { %v1309_v58 = vmul.f32 %v1291_v57, %v1291_v57 }
 0x35d   :  { %1981 = vmatpush3.xpose.msk.msra.mxu1 %vm22_vm1, %v1132_v52  ;;  %2021 = vmatpush3.xpose.msk.msra.mxu0 %vm22_vm1, %v1319_v2  ;;  %v1274_v52 = vmax.f32 %v1124_v48, 1e-07 }
 0x35e   :  { %1982 = vmatprep.subr.msk.mxu1 %vm22_vm1, %v1131_v62  ;;  %2022 = vmatprep.subr.mxu0 %v2128_v6 }
 0x35f   :  { %v1292_v33 = vsel %vm1266_vm4, %v1274_v52, 0.0 }
 0x360   :  { %v1310_v56 = vmul.f32 %v1292_v33, %v1292_v33 }
 0x361   :  { %1983 = vmatpush3.xpose.msk.msra.mxu1 %vm22_vm1, %v1131_v62  ;;  %2023 = vmatpush3.xpose.msk.msra.mxu0 %vm22_vm1, %v1318_v10 }
 0x362   :  { %1984 = vmatprep.subr.msk.mxu1 %vm22_vm1, %v1130_v5  ;;  %2024 = vmatprep.subr.mxu0 %v2128_v6 }
 0x365   :  { %1985 = vmatpush3.xpose.msk.msra.mxu1 %vm22_vm1, %v1130_v5  ;;  %2025 = vmatpush3.xpose.msk.msra.mxu0 %vm22_vm1, %v1317_v16 }
 0x366   :  { %1986 = vmatprep.subr.msk.mxu1 %vm22_vm1, %v1129_v14  ;;  %2026 = vmatprep.subr.mxu0 %v2128_v6 }
 0x369   :  { %1987 = vmatpush3.xpose.msk.msra.mxu1 %vm22_vm1, %v1129_v14  ;;  %2027 = vmatpush3.xpose.msk.msra.mxu0 %vm22_vm1, %v1316_v24 }
 0x36a   :  { %1988 = vmatprep.subr.msk.mxu1 %vm22_vm1, %v1128_v17  ;;  %2028 = vmatprep.subr.mxu0 %v2128_v6 }
 0x36d   :  { %1989 = vmatpush3.xpose.msk.msra.mxu1 %vm22_vm1, %v1128_v17  ;;  %2029 = vmatpush3.xpose.msk.msra.mxu0 %vm22_vm1, %v1315_v37 }
 0x36e   :  { %1990 = vmatprep.subr.msk.mxu1 %vm22_vm1, %v1127_v31  ;;  %2030 = vmatprep.subr.mxu0 %v2128_v6 }
 0x371   :  { %1991 = vmatpush3.xpose.msk.msra.mxu1 %vm22_vm1, %v1127_v31  ;;  %2031 = vmatpush3.xpose.msk.msra.mxu0 %vm22_vm1, %v1314_v43 }
 0x372   :  { %1992 = vmatprep.subr.msk.mxu1 %vm22_vm1, %v1126_v40  ;;  %2032 = vmatprep.subr.mxu0 %v2128_v6 }
 0x375   :  { %1993 = vmatpush3.xpose.msk.msra.mxu1 %vm22_vm1, %v1126_v40  ;;  %2033 = vmatpush3.xpose.msk.msra.mxu0 %vm22_vm1, %v1313_v47 }
 0x376   :  { %1994 = vmatprep.subr.msk.mxu1 %vm22_vm1, %v1125_v46  ;;  %2034 = vmatprep.subr.mxu0 %v2128_v6 }
 0x379   :  { %1995 = vmatpush3.xpose.msk.msra.mxu1 %vm22_vm1, %v1125_v46  ;;  %2035 = vmatpush3.xpose.msk.msra.mxu0 %vm22_vm1, %v1312_v51 }
 0x37a   :  { %1996 = vmatprep.subr.msk.mxu1 %vm22_vm1, %v1124_v48  ;;  %2036 = vmatprep.subr.mxu0 %v2128_v6 }
 0x37d   :  { %1997 = vmatpush3.xpose.msk.msra.mxu1 %vm22_vm1, %v1124_v48  ;;  %2037 = vmatpush3.xpose.msk.msra.mxu0 %vm22_vm1, %v1311_v3 }
 0x37e   :  { %1998 = vmatprep.subr.msk.mxu1 %vm22_vm1, %v1123_v53  ;;  %2038 = vmatprep.subr.mxu0 %v2128_v6 }
 0x381   :  { %1999 = vmatpush3.xpose.msk.msra.mxu1 %vm22_vm1, %v1123_v53  ;;  %2039 = vmatpush3.xpose.msk.msra.mxu0 %vm22_vm1, %v1310_v56 }
 0x382   :  { %2000 = vmatprep.subr.msk.mxu1 %vm22_vm1, %v2438_v25  ;;  %2040 = vmatprep.subr.mxu0 %v2128_v6 }
 0x385   :  { %2001 = vmatpush3.xpose.msk.msra.mxu1 %vm22_vm1, %v2438_v25  ;;  %2041 = vmatpush3.xpose.msk.msra.mxu0 %vm22_vm1, %v1309_v58  ;;  %v1307_v25 = vmul.f32 %v2467_v38, %v2467_v38 }
 0x386   :  { %2002 = vmatprep.subr.msk.mxu1 %vm22_vm1, %v2452_v32  ;;  %2042 = vmatprep.subr.mxu0 %v2128_v6 }
 0x389   :  { %2003 = vmatpush3.xpose.msk.msra.mxu1 %vm22_vm1, %v2452_v32  ;;  %2043 = vmatpush3.xpose.msk.msra.mxu0 %vm22_vm1, %v1308_v1  ;;  %v1306_v32 = vmul.f32 %v2435_v23, %v2435_v23 }
 0x38a   :  { %2004 = vmatprep.subr.msk.mxu1 %vm22_vm1, %v2419_v13  ;;  %2044 = vmatprep.subr.mxu0 %v2128_v6 }
 0x38d   :  { %2005 = vmatpush3.xpose.msk.msra.mxu1 %vm22_vm1, %v2419_v13  ;;  %2045 = vmatpush3.xpose.msk.msra.mxu0 %vm22_vm1, %v1307_v25  ;;  %v1305_v13 = vmul.f32 %v2449_v30, %v2449_v30 }
 0x38e   :  { %2006 = vmatprep.subr.msk.mxu1 %vm22_vm1, %v2426_v18  ;;  %2046 = vmatprep.subr.mxu0 %v2128_v6 }
 0x391   :  { %2007 = vmatpush3.xpose.msk.msra.mxu1 %vm22_vm1, %v2426_v18  ;;  %2047 = vmatpush3.xpose.msk.msra.mxu0 %vm22_vm1, %v1306_v32  ;;  %v2130_v18 = vmov 1.0  }
 0x392   :  { %2011 = vmatprep.subr.mxu1 %v2128_v6  ;;  %2048 = vmatprep.subr.mxu0 %v2128_v6 }
 0x394   :  { %2009 = vmatmul.mubr.msk.f32.vlgmr.msra.gmra.mxu1 %vm22_vm1, %v1118_v4 }
 0x395   :  { %2012 = vmatpush3.xpose.msk.msra.mxu1 %vm22_vm1, %v2445_v29  ;;  %2049 = vmatpush3.xpose.msk.msra.mxu0 %vm22_vm1, %v1305_v13 }
 0x396   :  { %2013 = vmatprep.subr.mxu1 %v2128_v6  ;;  %2015 = vmatprep.mubr.msk.f32.mxu1 %vm2129_vm3, %v2128_v6 }
 0x398   :  { %2051 = vmatmul.mubr.msk.f32.vlgmr.msra.gmra.mxu0 %vm22_vm1, %v2130_v18 }
 0x399   :  { %2014 = vmatpush3.xpose.msk.msra.mxu1 %vm22_vm1, %v2431_v22 }
 0x39c   :  { %2016 = vmatmul.mubr.msk.f32.vlgmr.msra.gmra.mxu1 %vm22_vm1, %v2130_v18 }
 0x3c5   :  { %v1537_v0 = vpop.xlane.xlu0 %1536 }
 0x3c6   :  { %2076 = vrsqrt.f32 %v1537_v0 }
 0x3c9   :  { %v1540_v4 = vpop.xlane.xlu0 %1539 }
 0x3ca   :  { %2078 = vrsqrt.f32 %v1540_v4 }
 0x3d3   :  { %v2077_v62 = vpop.eup %2076 }
 0x3d7   :  { %v2079_v63 = vpop.eup %2078 }
 0x454   :  { %v2010_v23 = vpop.f32.mrf.mxu1 }
 0x455   :  { %v1545_v2 = vmul.f32 %v2079_v63, %v2010_v23 }
 0x456   :  { %v1255_v30 = vpop.f32.mrf.mxu1 }
 0x457   :  { %v1544_v5 = vmul.f32 %v2077_v62, %v1255_v30 }
 0x458   :  { %v1514_v29 = vpop.f32.mrf.mxu0 }
 0x459   :  { %2080 = vrsqrt.f32 %v1514_v29  ;;  %vm1529_vm5 = vcmp.eq.f32.partialorder %v1514_v29, inf  ;;  %v1532_v9 = vand.u32 2147483648, %v1514_v29  ;;  %vm1531_vm6 = vcmp.eq.f32.partialorder %v1514_v29, 0.0 }
 0x45a   :  { %v2052_v34 = vpop.f32.mrf.mxu0 }
 0x45c   :  { %v1396_v38 = vpop.f32.mrf.mxu1 }
 0x45d   :  { %2082 = vrsqrt.f32 %v1396_v38  ;;  %vm1520_vm7 = vcmp.eq.f32.partialorder %v1396_v38, inf  ;;  %v1523_v19 = vand.u32 2147483648, %v1396_v38  ;;  %vm1522_vm9 = vcmp.eq.f32.partialorder %v1396_v38, 0.0 }
 0x45e   :  { %v2017_v6 = vpop.f32.mrf.mxu1 }
 0x466   :  { %v2081_v22 = vpop.eup %2080 }
 0x467   :  { %v1528_v7 = vmul.f32 %v2081_v22, %v1514_v29  ;;  %v1549_v8 = vrot.slane %v2081_v22, %v1548_v60 }
 0x469   :  { %v1530_v10 = vsel %vm1529_vm5, %v1514_v29, %v1528_v7  ;;  %v1550_v11 = vmul.f32 %v1549_v8, %v1544_v5  ;;  %v1551_v12 = vmul.f32 %v1549_v8, %v1545_v2 }
 0x46a   :  { %v2083_v14 = vpop.eup %2082  ;;  %v1533_v15 = vsel %vm1531_vm6, %v1532_v9, %v1530_v10 }
 0x46b   :  { %1534 = vst [vmem:[%s2619_s6] sm:$0x1] %v1533_v15  ;;  %v1552_v61 = vmax.f32 %v1550_v11, 1e-05  ;;  %v1553_v16 = vmax.f32 %v1551_v12, 1e-05  ;;  %v1519_v17 = vmul.f32 %v2083_v14, %v1396_v38 }
 0x46d   :  { %v1554_v20 = vmin.f32 %v1552_v61, 0.99999  ;;  %v1555_v21 = vmin.f32 %v1553_v16, 0.99999  ;;  %v1521_v24 = vsel %vm1520_vm7, %v1396_v38, %v1519_v17 }
 0x46e   :  { %v1524_v26 = vsel %vm1522_vm9, %v1523_v19, %v1521_v24 }
 0x46f   :  { %1556 = vst [vmem:[#allocation3] sm:$0xff] %v1554_v20  ;;  %1557 = vst [vmem:[#allocation3 + $0x8] sm:$0xff] %v1555_v21 }
 0x470   :  { %1526 = vst.msk [vmem:[#allocation5] sm:$0x1] %vm1525_vm8, %v1524_v26 }
 0x471   :  { %2095 = shalt.err (!%p2092_p4)
}
 0x472   :  { %s2133_s6 = smov 128   ;;  %s2134_s12 = smov 8  }
 0x473   :  { %1569 = dma.vmem_to_hbm [thread:$0]  %s1564_s30, 256, %s2617_s4, [#allocation4], %s2133_s6, %s2133_s6, %s2134_s12  }
 0x474   :  { %s2104_s15 = scalar_lea.vmem %s1577_s10, 16  ;;  %s2108_s16 = scalar_lea.vmem %s1577_s10, 32 }
 0x475   :  { %p2105_p5 = scmp.ne.s32.totalorder %s1577_s10, %s2104_s15  ;;  %p2109_p6 = scmp.lt.s32.totalorder %s1577_s10, %s1577_s10 }
 0x476   :  { %p2110_p7 = scmp.lt.s32.totalorder %s2108_s16, %s2104_s15 }
 0x478   :  { %p2111_p8 = por %p2110_p7, %p2109_p6 }
 0x47a   :  { %p2112_p9 = pnand %p2111_p8, %p2105_p5 }
 0x47c   :  { %2115 = shalt.err (!%p2112_p9)
}
 0x47d   :  { %1579 = dma.vmem_to_hbm [thread:$0]  %s1577_s10, 16, %s2618_s5, [#allocation6]  }
 0x47e   :  { %2124 = dma.done.wait [#allocation4], 256  }
 0x47f   :  { %2125 = vsyncadd [#allocation4], 4294967040 }
 0x480   :  { %2126 = dma.done.wait [#allocation6], 16  }
 0x481   :  { %2127 = vsyncadd [#allocation6], 4294967280 }
 0x482   :  { %1590 = vsyncpa [#allocation4], 1 }
 0x483   :  { %1591 = vsyncpa [#allocation6], 1 }

</bundles_post_ra>
